<compile_context>
chip_gen: v7x
topology: tpu7x:2x2x1
jax: 0.10.0
libtpu: 0.0.40
codegen_flags: <defaults>
</compile_context>

<pallas_src>
import jax
import jax.numpy as jnp
from jax.experimental import pallas as pl
from jax.experimental.pallas import tpu as pltpu


def _round_up(x, m):
    return (x + m - 1) // m * m


def _residual_linear_kernel(x_ref, w_ref, b_ref, o_ref):
    # x_ref: (TM, D) tile of flattened tokens
    # w_ref: (D, D) full weight (constant block index -> resident in VMEM)
    # b_ref: (1, D) bias        (constant block index -> resident in VMEM)
    x = x_ref[...]
    y = jnp.dot(x, w_ref[...], preferred_element_type=jnp.float32)
    y = y + b_ref[...].astype(jnp.float32)
    # residual add: x + fn(x), accumulated in f32
    o_ref[...] = (x.astype(jnp.float32) + y).astype(o_ref.dtype)


def residual_linear(x, w, b, *, tm=1024):
    """out = x + (x @ w + b), fused in one Pallas kernel.

    x: [B, N, D]
    w: [D, D]
    b: [D]
    """
    B, N, D = x.shape
    M = B * N
    x2 = x.reshape(M, D)
    b2 = b.reshape(1, D)

    # Large row tiles amortize per-grid-step overhead (kernel is HBM-bound).
    # Clamp to the (8-aligned) row count so small inputs don't over-pad, and
    # pad the rows up to a multiple of the tile so any B*N works.
    tm_eff = min(tm, _round_up(M, 8))
    M_pad = _round_up(M, tm_eff)
    if M_pad != M:
        x2 = jnp.pad(x2, ((0, M_pad - M), (0, 0)))

    itemsize = x.dtype.itemsize
    cost = pl.CostEstimate(
        flops=2 * M_pad * D * D + 2 * M_pad * D,
        transcendentals=0,
        bytes_accessed=2 * M_pad * D * itemsize + (D * D + D) * w.dtype.itemsize,
    )

    out = pl.pallas_call(
        _residual_linear_kernel,
        out_shape=jax.ShapeDtypeStruct((M_pad, D), x.dtype),
        grid_spec=pltpu.PrefetchScalarGridSpec(
            num_scalar_prefetch=0,
            grid=(M_pad // tm_eff,),
            in_specs=[
                pl.BlockSpec((tm_eff, D), lambda i: (i, 0)),   # x rows, tiled
                pl.BlockSpec((D, D), lambda i: (0, 0)),        # full weight, resident
                pl.BlockSpec((1, D), lambda i: (0, 0)),        # bias, resident
            ],
            out_specs=pl.BlockSpec((tm_eff, D), lambda i: (i, 0)),
        ),
        # Mirror the PyTorch in-place `x.add_(y)` branch: write result back
        # into x's (possibly padded) buffer.  Safe: each block's read of x
        # completes before its own writeback in the pipeline.
        input_output_aliases={0: 0},
        compiler_params=pltpu.CompilerParams(
            dimension_semantics=("parallel",),
        ),
        cost_estimate=cost,
    )(x2, w, b2)

    if M_pad != M:
        out = out[:M]
    return out.reshape(B, N, D)


def residual_linear_ref(x, w, b):
    # pure-JAX reference: Residual(Linear).forward
    return x + (jnp.einsum("bnd,de->bne", x, w) + b)


if __name__ == "__main__":
    key = jax.random.PRNGKey(0)
    B, N, D = 2, 8, 128
    kx, kw, kb = jax.random.split(key, 3)
    x = jax.random.normal(kx, (B, N, D), dtype=jnp.float32)
    # deterministic "fn" parameters (Linear(D, D))
    w = jax.random.normal(kw, (D, D), dtype=jnp.float32) * (1.0 / (D ** 0.5))
    b = jax.random.normal(kb, (D,), dtype=jnp.float32) * 0.01

    # compute reference first (kernel output aliases x's buffer by design)
    ref = residual_linear_ref(x, w, b)

    out = residual_linear(x, w, b)
    out = jax.block_until_ready(out)

    assert out.shape == (B, N, D)
    assert jnp.allclose(out, ref, atol=1e-4, rtol=1e-4), "mismatch vs reference"

    print("KERNEL_OK")
</pallas_src>

<mosaic_0001>
module attributes {stable_mosaic.version = 11 : i64} {
  func.func @_residual_linear_kernel(%arg0: i32, %arg1: memref<16x128xf32, #tpu.memory_space<vmem>>, %arg2: memref<128x128xf32, #tpu.memory_space<vmem>>, %arg3: memref<1x128xf32, #tpu.memory_space<vmem>>, %arg4: memref<16x128xf32, #tpu.memory_space<vmem>>) attributes {dimension_semantics = [#tpu.dimension_semantics<parallel>], iteration_bounds = array<i64: 1>, scalar_prefetch = 0 : i64, scratch_operands = 0 : i64, tpu.core_type = #tpu.core_type<tc>, window_params = [{transform_indices = @transform_0, window_bounds = array<i64: 16, 128>}, {pipeline_mode = #tpu.pipeline_mode<synchronous>, transform_indices = @transform_1, window_bounds = array<i64: 128, 128>}, {pipeline_mode = #tpu.pipeline_mode<synchronous>, transform_indices = @transform_2, window_bounds = array<i64: 1, 128>}, {transform_indices = @transform_3, window_bounds = array<i64: 16, 128>}]} {
    %c0 = arith.constant 0 : index
    %c0_0 = arith.constant 0 : index
    %0 = vector.load %arg1[%c0, %c0_0] : memref<16x128xf32, #tpu.memory_space<vmem>>, vector<16x128xf32>
    %c0_1 = arith.constant 0 : index
    %c0_2 = arith.constant 0 : index
    %1 = vector.load %arg2[%c0_1, %c0_2] : memref<128x128xf32, #tpu.memory_space<vmem>>, vector<128x128xf32>
    %cst = arith.constant dense<0.000000e+00> : vector<16x128xf32>
    %2 = tpu.matmul %0, %1, %cst {dimension_numbers = #tpu.dot_dimension_numbers<[1], [0], [0], [1], [0, 0, 1, 1], [], []>} : vector<16x128xf32>, vector<128x128xf32>, vector<16x128xf32> -> vector<16x128xf32>
    %c0_3 = arith.constant 0 : index
    %c0_4 = arith.constant 0 : index
    %3 = vector.load %arg3[%c0_3, %c0_4] : memref<1x128xf32, #tpu.memory_space<vmem>>, vector<1x128xf32>
    %4 = vector.broadcast %3 : vector<1x128xf32> to vector<16x128xf32>
    %5 = arith.addf %2, %4 : vector<16x128xf32>
    %6 = arith.addf %0, %5 : vector<16x128xf32>
    %c0_5 = arith.constant 0 : index
    %c0_6 = arith.constant 0 : index
    %7 = vector.load %arg4[%c0_5, %c0_6] : memref<16x128xf32, #tpu.memory_space<vmem>>, vector<16x128xf32>
    tpu.vector_store %arg4[%c0_5, %c0_6], %6 {strides = array<i32>} : memref<16x128xf32, #tpu.memory_space<vmem>>, vector<16x128xf32>,
    return
  }
  func.func @transform_0(%arg0: i32) -> (i32, i32) {
    %c0_i32 = arith.constant 0 : i32
    %c0_i32_0 = arith.constant 0 : i32
    return %arg0, %c0_i32 : i32, i32
  }
  func.func @transform_1(%arg0: i32) -> (i32, i32) {
    %c0_i32 = arith.constant 0 : i32
    %c0_i32_0 = arith.constant 0 : i32
    %c0_i32_1 = arith.constant 0 : i32
    return %c0_i32, %c0_i32_0 : i32, i32
  }
  func.func @transform_2(%arg0: i32) -> (i32, i32) {
    %c0_i32 = arith.constant 0 : i32
    %c0_i32_0 = arith.constant 0 : i32
    %c0_i32_1 = arith.constant 0 : i32
    return %c0_i32, %c0_i32_0 : i32, i32
  }
  func.func @transform_3(%arg0: i32) -> (i32, i32) {
    %c0_i32 = arith.constant 0 : i32
    %c0_i32_0 = arith.constant 0 : i32
    return %arg0, %c0_i32 : i32, i32
  }
}

</mosaic_0001>

<bundles_post_ra>
// kernel: tpu_custom_call.1
= control target key start
LH: loop header
LB: loop body
LE: loop exit
PB: predicated region body
PF: predicated region fallthrough
CT: control target
= control target key end

     0   :  { %8 = vsyncpa [#allocation3], 0  ;;  %s401_s0 = inlined_call_operand.hbm [shape: f32[16,128], index: 0, kind: input, shape index: {}, may-alias: {0,3}]   ;;  %s402_s1 = inlined_call_operand.hbm [shape: f32[128,128], index: 1, kind: input, shape index: {}]   ;;  %s403_s2 = inlined_call_operand.vmem [shape: f32[1,128], index: 2, kind: input, shape index: {}]   ;;  %s404_s3 = inlined_call_operand.hbm [shape: f32[16,128], index: 3, kind: output, shape index: {}, may-alias: {0,3}]  }
   0x1   :  { %9 = vsyncpa [#allocation6], 0 }
   0x2   :  { %10 = vsyncpa [#allocation4], 0  ;;  %s328_s12 = smov [#allocation2]   ;;  %s256_s16 = scalar_lea.hbm %s401_s0, 256 }
   0x3   :  { %s16_s13 = sshll.u32 %s328_s12, 4  ;;  %p257_p0 = scmp.ne.s32.totalorder %s401_s0, %s256_s16  ;;  %s17_s13 = int_to_ptr.vmem [resolvable:$true] %s16_s13 }
   0x4   :  { %p260_p1 = scmp.lt.u32.totalorder %s256_s16, %s401_s0 }
   0x6   :  { %p262_p2 = pnand %p260_p1, %p257_p0 }
   0x8   :  { %265 = shalt.err (!%p262_p2)
}
   0x9   :  { %s266_s21 = scalar_lea.vmem %s17_s13, 256  ;;  %p271_p4 = scmp.lt.s32.totalorder %s17_s13, %s17_s13 }
   0xa   :  { %p267_p3 = scmp.ne.s32.totalorder %s17_s13, %s266_s21  ;;  %p272_p5 = scmp.lt.s32.totalorder %s266_s21, %s266_s21 }
   0xc   :  { %p273_p6 = por %p272_p5, %p271_p4 }
   0xe   :  { %p274_p7 = pnand %p273_p6, %p267_p3 }
  0x10   :  { %277 = shalt.err (!%p274_p7)
}
  0x11   :  { %s329_s22 = smov 128   ;;  %s330_s23 = smov 8  }
  0x12   :  { %22 = dma.hbm_to_vmem [thread:$0]  %s401_s0, 256, %s17_s13, [#allocation3], %s329_s22, %s329_s22, %s330_s23  }
  0x13   :  { %s331_s26 = smov [#allocation5]   ;;  %s278_s30 = scalar_lea.hbm %s402_s1, 2048 }
  0x14   :  { %s28_s27 = sshll.u32 %s331_s26, 4  ;;  %p279_p8 = scmp.ne.s32.totalorder %s402_s1, %s278_s30  ;;  %s29_s27 = int_to_ptr.vmem [resolvable:$true] %s28_s27 }
  0x15   :  { %p282_p9 = scmp.lt.u32.totalorder %s278_s30, %s402_s1 }
  0x17   :  { %p284_p10 = pnand %p282_p9, %p279_p8 }
  0x19   :  { %287 = shalt.err (!%p284_p10)
}
  0x1a   :  { %s288_s8 = scalar_lea.vmem %s29_s27, 2048  ;;  %p293_p12 = scmp.lt.s32.totalorder %s29_s27, %s29_s27 }
  0x1b   :  { %p289_p11 = scmp.ne.s32.totalorder %s29_s27, %s288_s8  ;;  %p294_p13 = scmp.lt.s32.totalorder %s288_s8, %s288_s8 }
  0x1d   :  { %p295_p0 = por %p294_p13, %p293_p12 }
  0x1f   :  { %p296_p1 = pnand %p295_p0, %p289_p11 }
  0x21   :  { %299 = shalt.err (!%p296_p1)
}
  0x22   :  { %34 = dma.hbm_to_vmem [thread:$0]  %s402_s1, 2048, %s29_s27, [#allocation6], %s329_s22, %s329_s22, %s330_s23  }
  0x23   :  { %322 = dma.done.wait [#allocation3], 256  }
  0x24   :  { %323 = vsyncadd [#allocation3], 4294967040 }
  0x25   :  { %324 = dma.done.wait [#allocation6], 2048  }
  0x26   :  { %325 = vsyncadd [#allocation6], 4294965248  ;;  %v45_v0 = vld [vmem:[#allocation5] sm:$0xff]  ;;  %v46_v1 = vld [vmem:[#allocation5 + $0x8] sm:$0xff]  ;;  %s332_s11 = smov [#allocation7]  }
  0x27   :  { %v47_v2 = vld [vmem:[#allocation5 + $0x10] sm:$0xff]  ;;  %v219_v3 = vpack.c.bf16 %v46_v1, %v45_v0  ;;  %v48_v4 = vld [vmem:[#allocation5 + $0x18] sm:$0xff]  ;;  %v49_v6 = vld [vmem:[#allocation5 + $0x20] sm:$0xff]  ;;  %s152_s12 = sshll.u32 %s332_s11, 4  ;;  %s153_s12 = int_to_ptr.vmem [resolvable:$true] %s152_s12 }
  0x28   :  { %v223_v5 = vpack.c.bf16 %v48_v4, %v47_v2  ;;  %v50_v7 = vld [vmem:[#allocation5 + $0x28] sm:$0xff]  ;;  %v43_v9 = vld [vmem:[#allocation2] sm:$0xff]  ;;  %v52_v11 = vld [vmem:[#allocation5 + $0x38] sm:$0xff]  ;;  %s300_s13 = scalar_lea.vmem %s153_s12, 256  ;;  %p305_p3 = scmp.lt.s32.totalorder %s153_s12, %s153_s12 }
  0x29   :  { %220 = vmatprep.subr.bf16.mxu0 %v219_v3  ;;  %v227_v8 = vpack.c.bf16 %v50_v7, %v49_v6  ;;  %v51_v10 = vld [vmem:[#allocation5 + $0x30] sm:$0xff]  ;;  %216 = vmatprep.mubr.f32.mxu0 %v43_v9  ;;  %v53_v13 = vld [vmem:[#allocation5 + $0x40] sm:$0xff]  ;;  %v54_v14 = vld [vmem:[#allocation5 + $0x48] sm:$0xff]  ;;  %p301_p2 = scmp.ne.s32.totalorder %s153_s12, %s300_s13  ;;  %p306_p4 = scmp.lt.s32.totalorder %s300_s13, %s300_s13 }
  0x2a   :  { %222 = vmatpush3.bf16.msra.mxu0 %v219_v3  ;;  %v231_v12 = vpack.c.bf16 %v52_v11, %v51_v10  ;;  %v235_v15 = vpack.c.bf16 %v54_v14, %v53_v13  ;;  %v55_v16 = vld [vmem:[#allocation5 + $0x50] sm:$0xff]  ;;  %v56_v17 = vld [vmem:[#allocation5 + $0x58] sm:$0xff]  ;;  %v57_v19 = vld [vmem:[#allocation5 + $0x60] sm:$0xff] }
  0x2b   :  { %224 = vmatprep.subr.bf16.mxu0 %v223_v5  ;;  %v239_v18 = vpack.c.bf16 %v56_v17, %v55_v16  ;;  %v58_v20 = vld [vmem:[#allocation5 + $0x68] sm:$0xff]  ;;  %v59_v22 = vld [vmem:[#allocation5 + $0x70] sm:$0xff]  ;;  %v60_v23 = vld [vmem:[#allocation5 + $0x78] sm:$0xff]  ;;  %p307_p5 = por %p306_p4, %p305_p3 }
  0x2c   :  { %v243_v21 = vpack.c.bf16 %v58_v20, %v57_v19  ;;  %v247_v24 = vpack.c.bf16 %v60_v23, %v59_v22  ;;  %v44_v25 = vld [vmem:[#allocation2 + $0x8] sm:$0xff]  ;;  %v165_v26 = vld [vmem:[%s403_s2] ss:$0 sm:$0xff] }
  0x2d   :  { %p308_p6 = pnand %p307_p5, %p301_p2 }
  0x2e   :  { %226 = vmatpush3.bf16.msra.mxu0 %v223_v5 }
  0x2f   :  { %228 = vmatprep.subr.bf16.mxu0 %v227_v8 }
  0x32   :  { %230 = vmatpush3.bf16.msra.mxu0 %v227_v8 }
  0x33   :  { %232 = vmatprep.subr.bf16.mxu0 %v231_v12 }
  0x36   :  { %234 = vmatpush3.bf16.msra.mxu0 %v231_v12 }
  0x37   :  { %236 = vmatprep.subr.bf16.mxu0 %v235_v15 }
  0x3a   :  { %238 = vmatpush3.bf16.msra.mxu0 %v235_v15 }
  0x3b   :  { %240 = vmatprep.subr.bf16.mxu0 %v239_v18 }
  0x3e   :  { %242 = vmatpush3.bf16.msra.mxu0 %v239_v18 }
  0x3f   :  { %244 = vmatprep.subr.bf16.mxu0 %v243_v21 }
  0x42   :  { %246 = vmatpush3.bf16.msra.mxu0 %v243_v21 }
  0x43   :  { %248 = vmatprep.subr.bf16.mxu0 %v247_v24 }
  0x46   :  { %250 = vmatpush3.bf16.msra.mxu0 %v247_v24 }
  0x49   :  { %217 = vmatmul.mubr.f32.vlgmr.msra.gmra.mrb[0].mxu0 %v44_v25 }
 0x11c   :  { %v218_v27 = vpop.f32.mrb[0].mxu0 }
 0x11d   :  { %v140_v28 = vadd.f32 %v218_v27, %v165_v26  ;;  %v134_v29 = vpop.f32.mrb[1].mxu0 }
 0x11e   :  { %v135_v30 = vadd.f32 %v165_v26, %v134_v29 }
 0x11f   :  { %v144_v31 = vadd.f32 %v140_v28, %v44_v25 }
 0x120   :  { %v143_v32 = vadd.f32 %v135_v30, %v43_v9 }
 0x121   :  { %146 = vst [vmem:[#allocation7 + $0x8] sm:$0xff] %v144_v31 }
 0x122   :  { %145 = vst [vmem:[#allocation7] sm:$0xff] %v143_v32 }
 0x123   :  { %311 = shalt.err (!%p308_p6)
}
 0x124   :  { %s312_s15 = scalar_lea.hbm %s404_s3, 256 }
 0x125   :  { %p313_p7 = scmp.ne.s32.totalorder %s404_s3, %s312_s15  ;;  %p316_p8 = scmp.lt.u32.totalorder %s312_s15, %s404_s3 }
 0x127   :  { %p318_p9 = pnand %p316_p8, %p313_p7 }
 0x129   :  { %321 = shalt.err (!%p318_p9)
}
 0x12a   :  { %158 = dma.vmem_to_hbm [thread:$0]  %s153_s12, 256, %s404_s3, [#allocation4], %s329_s22, %s329_s22, %s330_s23  }
 0x12b   :  { %326 = dma.done.wait [#allocation4], 256  }
 0x12c   :  { %327 = vsyncadd [#allocation4], 4294967040 }
 0x12d   :  { %162 = vsyncpa [#allocation3], 1 }
 0x12e   :  { %163 = vsyncpa [#allocation6], 1 }
 0x12f   :  { %164 = vsyncpa [#allocation4], 1 }

</bundles_post_ra>
